<compile_context>
chip_gen: v5e
topology: v5e:2x2
jax: 0.10.0
libtpu: 0.0.40
codegen_flags: <defaults>
</compile_context>

<pallas_src>
import jax
import jax.numpy as jnp
from jax.experimental import pallas as pl
from jax.experimental.pallas import tpu as pltpu


_TARGET_BLOCK_BYTES = 2 * 1024 * 1024   # ~2 MiB per block, safe on v5e/v6e/v7x
_MIN_KERNEL_BYTES = 128 * 1024          # below this, XLA's fused path wins
_WIDTHS = (1024, 512, 256, 128)         # lane-dense slab widths (multiples of 128)


def _sublane_for(itemsize: int) -> int:
    # Sub-32-bit dtypes pack along sublanes: (8,128) f32, (16,128) bf16, (32,128) 1-byte.
    if itemsize >= 4:
        return 8
    if itemsize == 2:
        return 16
    return 32


def _round_up(a: int, m: int) -> int:
    return ((a + m - 1) // m) * m


def _tensorcores_per_chip() -> int:
    """Best-effort megacore detection (v7x/v5p/v4 expose 2 TCs per device)."""
    try:
        kind = jax.devices()[0].device_kind.lower()
    except Exception:
        return 1
    if any(tag in kind for tag in ("v7", "v5p", "v4")):
        return 2
    return 1


def _hardswish_kernel(x_ref, o_ref):
    # Elementwise: one vld, ~5 VALU ops, one vst per vreg.  HBM-bound, so the
    # f32 upcast / gate math is free filler on the VPU.
    x = x_ref[...]
    xf = x.astype(jnp.float32)
    gate = jnp.clip(xf * (1.0 / 6.0) + 0.5, 0.0, 1.0)
    o_ref[...] = (xf * gate).astype(o_ref.dtype)


def _jnp_hardswish(x: jax.Array) -> jax.Array:
    xf = x.astype(jnp.float32)
    gate = jnp.clip(xf * (1.0 / 6.0) + 0.5, 0.0, 1.0)
    return (xf * gate).astype(x.dtype)


def hard_swish(x: jax.Array) -> jax.Array:
    """Elementwise HardSwish via a Pallas TPU kernel. Works for any shape."""
    if not jnp.issubdtype(x.dtype, jnp.floating):
        raise TypeError(
            f"hard_swish expects a floating-point input, got {x.dtype}")

    orig_shape = x.shape
    dtype = x.dtype
    itemsize = jnp.dtype(dtype).itemsize
    n = int(x.size)

    flat = x.reshape(-1)   # metadata-only for contiguous arrays (no HBM copy)

    # Tiny tensors: kernel-launch + DMA prologue overhead dwarfs HBM time.
    # Tensors whose size is not a multiple of 128 lanes: XLA's fused
    # elementwise pass is already at HBM roofline and avoids any extra
    # slice/concat HBM traffic (the previous version's main perf leak).
    if n * itemsize < _MIN_KERNEL_BYTES or n % 128 != 0:
        return _jnp_hardswish(flat).reshape(orig_shape)

    # Lane-dense slab: widest width (<=1024) that divides n exactly, so the
    # reshape is free and every store is an unmasked full-width vst.
    width = next(w for w in _WIDTHS if n % w == 0)
    rows = n // width

    sublane = _sublane_for(itemsize)

    # Block rows: ~2 MiB per block in bytes, multiple of the packed sublane
    # count, never larger than needed to cover the whole array in one block.
    target_rows = max(sublane,
                      (_TARGET_BLOCK_BYTES // (width * itemsize)) // sublane * sublane)
    tr = min(target_rows, _round_up(rows, sublane))

    # Megacore only: split into >=4 balanced blocks so both TensorCores'
    # DMA paths are used.  Single-TC chips (v5e/v6e) keep the big block.
    if _tensorcores_per_chip() > 1:
        min_steps = min(4, max(1, rows // sublane))
        if pl.cdiv(rows, tr) < min_steps:
            tr = max(sublane, _round_up(pl.cdiv(rows, min_steps), sublane))

    grid = (pl.cdiv(rows, tr),)   # ragged last row-block is masked by Pallas

    cost = pl.CostEstimate(flops=5 * n, transcendentals=0,
                           bytes_accessed=2 * n * itemsize)

    out2d = pl.pallas_call(
        _hardswish_kernel,
        out_shape=jax.ShapeDtypeStruct((rows, width), dtype),
        grid_spec=pl.GridSpec(
            grid=grid,
            in_specs=[pl.BlockSpec((tr, width), lambda i: (i, 0))],
            out_specs=pl.BlockSpec((tr, width), lambda i: (i, 0)),
        ),
        compiler_params=pltpu.CompilerParams(
            dimension_semantics=("parallel",)),
        cost_estimate=cost,
    )(flat.reshape(rows, width))

    return out2d.reshape(orig_shape)


def _ref_hard_swish(x: jax.Array) -> jax.Array:
    # Mirrors the PyTorch piecewise definition (fp32 opmath).
    xf = x.astype(jnp.float32)
    mid = (1.0 / 6.0) * xf * (xf + 3.0)
    out = jnp.where(xf <= -3.0, 0.0, jnp.where(xf >= 3.0, xf, mid))
    return out.astype(x.dtype)


if __name__ == "__main__":
    key = jax.random.PRNGKey(0)

    # Scale inputs by 4 so all three branches (<=-3, mid, >=3) are exercised.
    cases = [
        ((2, 4, 16, 16), jnp.float32),     # tiny NCHW -> fused-jnp path
        ((3, 5, 17, 13), jnp.float32),     # tiny & ragged -> fused-jnp path
        ((4, 8, 64, 64), jnp.float32),     # 512 KiB -> kernel, 1024-lane slab
        ((4, 8, 64, 64), jnp.bfloat16),    # bf16 -> packed (16,128) tiles, f32 opmath
        ((8, 16, 128, 128), jnp.float32),  # 8 MiB -> multi-block pipelined grid
    ]
    for i, (shape, dt) in enumerate(cases):
        k = jax.random.fold_in(key, i)
        x = (jax.random.normal(k, shape, dtype=jnp.float32) * 4.0).astype(dt)

        y = hard_swish(x)
        jax.block_until_ready(y)

        y_ref = _ref_hard_swish(x)
        assert y.shape == x.shape and y.dtype == x.dtype
        if dt == jnp.float32:
            ok = jnp.allclose(y, y_ref, atol=1e-5, rtol=1e-5)
        else:
            ok = jnp.allclose(y.astype(jnp.float32), y_ref.astype(jnp.float32),
                              atol=5e-2, rtol=2e-2)
        assert ok, f"mismatch vs reference for shape {shape} dtype {dt}"

    print("KERNEL_OK")
</pallas_src>

<mosaic_0001>
module attributes {stable_mosaic.version = 11 : i64} {
  func.func @_hardswish_kernel(%arg0: i32, %arg1: memref<128x1024xf32, #tpu.memory_space<vmem>>, %arg2: memref<128x1024xf32, #tpu.memory_space<vmem>>) attributes {dimension_semantics = [#tpu.dimension_semantics<parallel>], iteration_bounds = array<i64: 1>, scalar_prefetch = 0 : i64, scratch_operands = 0 : i64, tpu.core_type = #tpu.core_type<tc>, window_params = [{transform_indices = @transform_0, window_bounds = array<i64: 128, 1024>}, {transform_indices = @transform_1, window_bounds = array<i64: 128, 1024>}]} {
    %c0 = arith.constant 0 : index
    %c0_0 = arith.constant 0 : index
    %0 = vector.load %arg1[%c0, %c0_0] : memref<128x1024xf32, #tpu.memory_space<vmem>>, vector<128x1024xf32>
    %cst = arith.constant 0.166666672 : f32
    %1 = vector.broadcast %cst : f32 to vector<128x1024xf32>
    %2 = arith.mulf %0, %1 : vector<128x1024xf32>
    %cst_1 = arith.constant 5.000000e-01 : f32
    %3 = vector.broadcast %cst_1 : f32 to vector<128x1024xf32>
    %4 = arith.addf %2, %3 : vector<128x1024xf32>
    %cst_2 = arith.constant 0.000000e+00 : f32
    %cst_3 = arith.constant 1.000000e+00 : f32
    %5 = vector.broadcast %cst_2 : f32 to vector<128x1024xf32>
    %6 = arith.maximumf %5, %4 : vector<128x1024xf32>
    %7 = vector.broadcast %cst_3 : f32 to vector<128x1024xf32>
    %8 = arith.minimumf %7, %6 : vector<128x1024xf32>
    %9 = arith.mulf %0, %8 : vector<128x1024xf32>
    %c0_4 = arith.constant 0 : index
    %c0_5 = arith.constant 0 : index
    %10 = vector.load %arg2[%c0_4, %c0_5] : memref<128x1024xf32, #tpu.memory_space<vmem>>, vector<128x1024xf32>
    tpu.vector_store %arg2[%c0_4, %c0_5], %9 {strides = array<i32>} : memref<128x1024xf32, #tpu.memory_space<vmem>>, vector<128x1024xf32>,
    return
  }
  func.func @transform_0(%arg0: i32) -> (i32, i32) {
    %c0_i32 = arith.constant 0 : i32
    %c0_i32_0 = arith.constant 0 : i32
    return %arg0, %c0_i32 : i32, i32
  }
  func.func @transform_1(%arg0: i32) -> (i32, i32) {
    %c0_i32 = arith.constant 0 : i32
    %c0_i32_0 = arith.constant 0 : i32
    return %arg0, %c0_i32 : i32, i32
  }
}

</mosaic_0001>

<bundles_post_ra>
// kernel: tpu_custom_call.1
= control target key start
LH: loop header
LB: loop body
LE: loop exit
PB: predicated region body
PF: predicated region fallthrough
CT: control target
= control target key end

     0   :  { %6 = vsyncpa [#allocation3], 0  ;;  %s1390_s0 = inlined_call_operand.hbm [shape: f32[128,1024], index: 0, kind: input, shape index: {}]   ;;  %s1391_s1 = inlined_call_operand.hbm [shape: f32[128,1024], index: 1, kind: output, shape index: {}]  }
   0x1   :  { %7 = vsyncpa [#allocation4], 0  ;;  %s12_s8 = sshll.u32 %s1390_s0, 4  ;;  %s996_s9 = smov [#allocation2]   ;;  %s13_s8 = int_to_ptr.hbm [resolvable:$true] %s12_s8 }
   0x2   :  { %s14_s10 = sshll.u32 %s996_s9, 4  ;;  %s997_s11 = smov 1024   ;;  %s15_s10 = int_to_ptr.vmem [resolvable:$true] %s14_s10 }
   0x3   :  { %s998_s12 = smov 64  }
   0x4   :  { %20 = dma.hbm_to_vmem [thread:$0]  %s13_s8, 16384, %s15_s10, [#allocation3], %s997_s11, %s997_s11, %s998_s12  }
   0x5   :  { %992 = dma.done.wait [#allocation3], 16384  }
   0x6   :  { %993 = vsyncadd [#allocation3], 4294950912  ;;  %v25_v0 = vld [vmem:[#allocation2] sm:$0xff]  ;;  %v26_v1 = vld [vmem:[#allocation2 + $0x8] sm:$0xff]  ;;  %s999_s0 = smov [#allocation5]   ;;  %s927_s16 = sshll.u32 %s1391_s1, 4  ;;  %s928_s16 = int_to_ptr.hbm [resolvable:$true] %s927_s16 }
   0x7   :  { %v27_v2 = vld [vmem:[#allocation2 + $0x10] sm:$0xff]  ;;  %v153_v3 = vmul.f32 0.16666667, %v25_v0  ;;  %v154_v4 = vmul.f32 0.16666667, %v26_v1  ;;  %v28_v6 = vld [vmem:[#allocation2 + $0x18] sm:$0xff] }
   0x8   :  { %v155_v5 = vmul.f32 0.16666667, %v27_v2  ;;  %v29_v7 = vld [vmem:[#allocation2 + $0x20] sm:$0xff]  ;;  %v30_v8 = vld [vmem:[#allocation2 + $0x28] sm:$0xff]  ;;  %v156_v12 = vmul.f32 0.16666667, %v28_v6 }
   0x9   :  { %v281_v9 = vadd.f32 0.5, %v153_v3  ;;  %v282_v10 = vadd.f32 0.5, %v154_v4  ;;  %v31_v13 = vld [vmem:[#allocation2 + $0x30] sm:$0xff]  ;;  %v157_v14 = vmul.f32 0.16666667, %v29_v7  ;;  %v32_v21 = vld [vmem:[#allocation2 + $0x38] sm:$0xff] }
   0xa   :  { %v283_v11 = vadd.f32 0.5, %v155_v5  ;;  %v158_v15 = vmul.f32 0.16666667, %v30_v8  ;;  %v159_v16 = vmul.f32 0.16666667, %v31_v13  ;;  %v284_v20 = vadd.f32 0.5, %v156_v12 }
   0xb   :  { %v409_v17 = vmax.f32 %v281_v9, 0.0  ;;  %v410_v18 = vmax.f32 %v282_v10, 0.0  ;;  %v285_v22 = vadd.f32 0.5, %v157_v14  ;;  %v160_v25 = vmul.f32 0.16666667, %v32_v21  ;;  %v33_v34 = vld [vmem:[#allocation2 + $0x40] sm:$0xff] }
   0xc   :  { %v411_v19 = vmax.f32 %v283_v11, 0.0  ;;  %v286_v23 = vadd.f32 0.5, %v158_v15  ;;  %v287_v24 = vadd.f32 0.5, %v159_v16  ;;  %v412_v29 = vmax.f32 %v284_v20, 0.0  ;;  %v34_v35 = vld [vmem:[#allocation2 + $0x48] sm:$0xff]  ;;  %v35_v44 = vld [vmem:[#allocation2 + $0x50] sm:$0xff] }
   0xd   :  { %v537_v26 = vmin.f32 %v409_v17, 1.0  ;;  %v538_v27 = vmin.f32 %v410_v18, 1.0  ;;  %v413_v30 = vmax.f32 %v285_v22, 0.0  ;;  %v288_v33 = vadd.f32 0.5, %v160_v25  ;;  %v36_v45 = vld [vmem:[#allocation2 + $0x58] sm:$0xff]  ;;  %v37_v49 = vld [vmem:[#allocation2 + $0x60] sm:$0xff] }
   0xe   :  { %v539_v28 = vmin.f32 %v411_v19, 1.0  ;;  %v414_v31 = vmax.f32 %v286_v23, 0.0  ;;  %v415_v32 = vmax.f32 %v287_v24, 0.0  ;;  %v540_v39 = vmin.f32 %v412_v29, 1.0  ;;  %v38_v53 = vld [vmem:[#allocation2 + $0x68] sm:$0xff]  ;;  %v39_v58 = vld [vmem:[#allocation2 + $0x70] sm:$0xff] }
   0xf   :  { %v665_v36 = vmul.f32 %v537_v26, %v25_v0  ;;  %v666_v37 = vmul.f32 %v538_v27, %v26_v1  ;;  %v541_v40 = vmin.f32 %v413_v30, 1.0  ;;  %v416_v43 = vmax.f32 %v288_v33, 0.0  ;;  %v40_v62 = vld [vmem:[#allocation2 + $0x78] sm:$0xff]  ;;  %v1018_v11 = vld [vmem:[#allocation2 + $0x88] sm:$0xff]  ;;  %v1020_v20 = vld [vmem:[#allocation2 + $0x90] sm:$0xff]  ;;  %s925_s13 = sshll.u32 %s999_s0, 4  ;;  %s926_s13 = int_to_ptr.vmem [resolvable:$true] %s925_s13 }
  0x10   :  { %v667_v38 = vmul.f32 %v539_v28, %v27_v2  ;;  %v542_v41 = vmin.f32 %v414_v31, 1.0  ;;  %v543_v42 = vmin.f32 %v415_v32, 1.0  ;;  %v668_v46 = vmul.f32 %v540_v39, %v28_v6  ;;  %v1016_v6 = vld [vmem:[#allocation2 + $0x80] sm:$0xff]  ;;  %v1022_v25 = vld [vmem:[#allocation2 + $0x98] sm:$0xff] }
  0x11   :  { %793 = vst [vmem:[#allocation5] sm:$0xff] %v665_v36  ;;  %v161_v47 = vmul.f32 0.16666667, %v33_v34  ;;  %v162_v48 = vmul.f32 0.16666667, %v34_v35  ;;  %v669_v50 = vmul.f32 %v541_v40, %v29_v7  ;;  %v544_v52 = vmin.f32 %v416_v43, 1.0 }
  0x12   :  { %794 = vst [vmem:[#allocation5 + $0x8] sm:$0xff] %v666_v37  ;;  %v670_v51 = vmul.f32 %v542_v41, %v30_v8  ;;  %v671_v54 = vmul.f32 %v543_v42, %v31_v13  ;;  %v163_v57 = vmul.f32 0.16666667, %v35_v44  ;;  %v164_v60 = vmul.f32 0.16666667, %v36_v45  ;;  %v1024_v26 = vld [vmem:[#allocation2 + $0xa0] sm:$0xff] }
  0x13   :  { %795 = vst [vmem:[#allocation5 + $0x10] sm:$0xff] %v667_v38  ;;  %v289_v55 = vadd.f32 0.5, %v161_v47  ;;  %v290_v56 = vadd.f32 0.5, %v162_v48  ;;  %v672_v59 = vmul.f32 %v544_v52, %v32_v21  ;;  %v165_v61 = vmul.f32 0.16666667, %v37_v49  ;;  %v1028_v36 = vld [vmem:[#allocation2 + $0xb0] sm:$0xff] }
  0x14   :  { %796 = vst [vmem:[#allocation5 + $0x18] sm:$0xff] %v668_v46  ;;  %v291_v1 = vadd.f32 0.5, %v163_v57  ;;  %v166_v2 = vmul.f32 0.16666667, %v38_v53  ;;  %v292_v3 = vadd.f32 0.5, %v164_v60  ;;  %v1031_v41 = vld [vmem:[#allocation2 + $0xb8] sm:$0xff] }
  0x15   :  { %797 = vst [vmem:[#allocation5 + $0x20] sm:$0xff] %v669_v50  ;;  %v417_v63 = vmax.f32 %v289_v55, 0.0  ;;  %v418_v0 = vmax.f32 %v290_v56, 0.0  ;;  %v293_v4 = vadd.f32 0.5, %v165_v61  ;;  %v167_v5 = vmul.f32 0.16666667, %v39_v58 }
  0x16   :  { %798 = vst [vmem:[#allocation5 + $0x28] sm:$0xff] %v670_v51  ;;  %v419_v9 = vmax.f32 %v291_v1, 0.0  ;;  %v294_v10 = vadd.f32 0.5, %v166_v2  ;;  %v420_v12 = vmax.f32 %v292_v3, 0.0  ;;  %v168_v15 = vmul.f32 0.16666667, %v40_v62 }
  0x17   :  { %799 = vst [vmem:[#allocation5 + $0x30] sm:$0xff] %v671_v54  ;;  %v545_v7 = vmin.f32 %v417_v63, 1.0  ;;  %v546_v8 = vmin.f32 %v418_v0, 1.0  ;;  %v421_v13 = vmax.f32 %v293_v4, 0.0  ;;  %v295_v14 = vadd.f32 0.5, %v167_v5  ;;  %v1036_v54 = vld [vmem:[#allocation2 + $0xc0] sm:$0xff] }
  0x18   :  { %800 = vst [vmem:[#allocation5 + $0x38] sm:$0xff] %v672_v59  ;;  %v547_v18 = vmin.f32 %v419_v9, 1.0  ;;  %v422_v19 = vmax.f32 %v294_v10, 0.0  ;;  %v548_v21 = vmin.f32 %v420_v12, 1.0  ;;  %v296_v24 = vadd.f32 0.5, %v168_v15  ;;  %v1038_v59 = vld [vmem:[#allocation2 + $0xc8] sm:$0xff] }
  0x19   :  { %v673_v16 = vmul.f32 %v545_v7, %v33_v34  ;;  %v674_v17 = vmul.f32 %v546_v8, %v34_v35  ;;  %v549_v22 = vmin.f32 %v421_v13, 1.0  ;;  %v423_v23 = vmax.f32 %v295_v14, 0.0  ;;  %v46_v35 = vld [vmem:[#allocation2 + $0xa8] sm:$0xff]  ;;  %v1043_v4 = vld [vmem:[#allocation2 + $0xd0] sm:$0xff]  ;;  %v1045_v10 = vld [vmem:[#allocation2 + $0xd8] sm:$0xff] }
  0x1a   :  { %v675_v27 = vmul.f32 %v547_v18, %v35_v44  ;;  %v550_v28 = vmin.f32 %v422_v19, 1.0  ;;  %v169_v29 = vmul.f32 0.16666667, %v1016_v6  ;;  %v170_v30 = vmul.f32 0.16666667, %v1018_v11  ;;  %v1047_v12 = vld [vmem:[#allocation2 + $0xe0] sm:$0xff] }
  0x1b   :  { %801 = vst [vmem:[#allocation5 + $0x40] sm:$0xff] %v673_v16  ;;  %v676_v31 = vmul.f32 %v548_v21, %v36_v45  ;;  %v677_v32 = vmul.f32 %v549_v22, %v37_v49  ;;  %v551_v33 = vmin.f32 %v423_v23, 1.0  ;;  %v424_v34 = vmax.f32 %v296_v24, 0.0  ;;  %v54_v19 = vld [vmem:[#allocation2 + $0xe8] sm:$0xff]  ;;  %v1054_v21 = vld [vmem:[#allocation2 + $0xf0] sm:$0xff] }
  0x1c   :  { %802 = vst [vmem:[#allocation5 + $0x48] sm:$0xff] %v674_v17  ;;  %v678_v37 = vmul.f32 %v550_v28, %v38_v53  ;;  %v297_v38 = vadd.f32 0.5, %v169_v29  ;;  %v298_v39 = vadd.f32 0.5, %v170_v30  ;;  %v171_v40 = vmul.f32 0.16666667, %v1020_v20 }
  0x1d   :  { %803 = vst [vmem:[#allocation5 + $0x50] sm:$0xff] %v675_v27  ;;  %v679_v42 = vmul.f32 %v551_v33, %v39_v58  ;;  %v552_v43 = vmin.f32 %v424_v34, 1.0  ;;  %v172_v44 = vmul.f32 0.16666667, %v1022_v25  ;;  %v173_v45 = vmul.f32 0.16666667, %v1024_v26 }
  0x1e   :  { %804 = vst [vmem:[#allocation5 + $0x58] sm:$0xff] %v676_v31  ;;  %v425_v46 = vmax.f32 %v297_v38, 0.0  ;;  %v426_v47 = vmax.f32 %v298_v39, 0.0  ;;  %v299_v48 = vadd.f32 0.5, %v171_v40  ;;  %v174_v49 = vmul.f32 0.16666667, %v46_v35 }
  0x1f   :  { %805 = vst [vmem:[#allocation5 + $0x60] sm:$0xff] %v677_v32  ;;  %v680_v50 = vmul.f32 %v552_v43, %v40_v62  ;;  %v300_v51 = vadd.f32 0.5, %v172_v44  ;;  %v301_v52 = vadd.f32 0.5, %v173_v45  ;;  %v175_v53 = vmul.f32 0.16666667, %v1028_v36  ;;  %v1057_v27 = vld [vmem:[#allocation2 + $0xf8] sm:$0xff] }
  0x20   :  { %806 = vst [vmem:[#allocation5 + $0x68] sm:$0xff] %v678_v37  ;;  %v553_v55 = vmin.f32 %v425_v46, 1.0  ;;  %v554_v56 = vmin.f32 %v426_v47, 1.0  ;;  %v427_v57 = vmax.f32 %v299_v48, 0.0  ;;  %v302_v58 = vadd.f32 0.5, %v174_v49  ;;  %v1064_v39 = vld [vmem:[#allocation2 + $0x100] sm:$0xff] }
  0x21   :  { %807 = vst [vmem:[#allocation5 + $0x70] sm:$0xff] %v679_v42  ;;  %v428_v60 = vmax.f32 %v300_v51, 0.0  ;;  %v429_v61 = vmax.f32 %v301_v52, 0.0  ;;  %v303_v63 = vadd.f32 0.5, %v175_v53  ;;  %v176_v0 = vmul.f32 0.16666667, %v1031_v41 }
  0x22   :  { %808 = vst [vmem:[#allocation5 + $0x78] sm:$0xff] %v680_v50  ;;  %v681_v62 = vmul.f32 %v553_v55, %v1016_v6  ;;  %v682_v1 = vmul.f32 %v554_v56, %v1018_v11  ;;  %v555_v2 = vmin.f32 %v427_v57, 1.0  ;;  %v430_v3 = vmax.f32 %v302_v58, 0.0  ;;  %v1066_v44 = vld [vmem:[#allocation2 + $0x108] sm:$0xff]  ;;  %v1071_v52 = vld [vmem:[#allocation2 + $0x110] sm:$0xff]  ;;  %v1073_v58 = vld [vmem:[#allocation2 + $0x118] sm:$0xff] }
  0x23   :  { %v556_v5 = vmin.f32 %v428_v60, 1.0  ;;  %v557_v7 = vmin.f32 %v429_v61, 1.0  ;;  %v431_v8 = vmax.f32 %v303_v63, 0.0  ;;  %v304_v9 = vadd.f32 0.5, %v176_v0  ;;  %v1075_v60 = vld [vmem:[#allocation2 + $0x120] sm:$0xff] }
  0x24   :  { %809 = vst [vmem:[#allocation5 + $0x80] sm:$0xff] %v681_v62  ;;  %v683_v13 = vmul.f32 %v555_v2, %v1020_v20  ;;  %v558_v14 = vmin.f32 %v430_v3, 1.0  ;;  %v177_v6 = vmul.f32 0.16666667, %v1036_v54  ;;  %v178_v11 = vmul.f32 0.16666667, %v1038_v59 }
  0x25   :  { %810 = vst [vmem:[#allocation5 + $0x88] sm:$0xff] %v682_v1  ;;  %v684_v15 = vmul.f32 %v556_v5, %v1022_v25  ;;  %v685_v16 = vmul.f32 %v557_v7, %v1024_v26  ;;  %v559_v17 = vmin.f32 %v431_v8, 1.0  ;;  %v432_v18 = vmax.f32 %v304_v9, 0.0  ;;  %v62_v3 = vld [vmem:[#allocation2 + $0x128] sm:$0xff]  ;;  %v1082_v5 = vld [vmem:[#allocation2 + $0x130] sm:$0xff] }
  0x26   :  { %811 = vst [vmem:[#allocation5 + $0x90] sm:$0xff] %v683_v13  ;;  %v686_v22 = vmul.f32 %v558_v14, %v46_v35  ;;  %v305_v23 = vadd.f32 0.5, %v177_v6  ;;  %v306_v24 = vadd.f32 0.5, %v178_v11  ;;  %v179_v20 = vmul.f32 0.16666667, %v1043_v4  ;;  %v1085_v13 = vld [vmem:[#allocation2 + $0x138] sm:$0xff] }
  0x27   :  { %812 = vst [vmem:[#allocation5 + $0x98] sm:$0xff] %v684_v15  ;;  %v687_v28 = vmul.f32 %v559_v17, %v1028_v36  ;;  %v560_v29 = vmin.f32 %v432_v18, 1.0  ;;  %v180_v25 = vmul.f32 0.16666667, %v1045_v10  ;;  %v181_v26 = vmul.f32 0.16666667, %v1047_v12 }
  0x28   :  { %813 = vst [vmem:[#allocation5 + $0xa0] sm:$0xff] %v685_v16  ;;  %v433_v30 = vmax.f32 %v305_v23, 0.0  ;;  %v434_v31 = vmax.f32 %v306_v24, 0.0  ;;  %v307_v32 = vadd.f32 0.5, %v179_v20  ;;  %v182_v33 = vmul.f32 0.16666667, %v54_v19 }
  0x29   :  { %814 = vst [vmem:[#allocation5 + $0xa8] sm:$0xff] %v686_v22  ;;  %v688_v34 = vmul.f32 %v560_v29, %v1031_v41  ;;  %v308_v35 = vadd.f32 0.5, %v180_v25  ;;  %v309_v37 = vadd.f32 0.5, %v181_v26  ;;  %v183_v38 = vmul.f32 0.16666667, %v1054_v21  ;;  %v1092_v24 = vld [vmem:[#allocation2 + $0x140] sm:$0xff] }
  0x2a   :  { %815 = vst [vmem:[#allocation5 + $0xb0] sm:$0xff] %v687_v28  ;;  %v561_v36 = vmin.f32 %v433_v30, 1.0  ;;  %v562_v40 = vmin.f32 %v434_v31, 1.0  ;;  %v435_v42 = vmax.f32 %v307_v32, 0.0  ;;  %v310_v43 = vadd.f32 0.5, %v182_v33  ;;  %v1094_v25 = vld [vmem:[#allocation2 + $0x148] sm:$0xff] }
  0x2b   :  { %816 = vst [vmem:[#allocation5 + $0xb8] sm:$0xff] %v688_v34  ;;  %v436_v45 = vmax.f32 %v308_v35, 0.0  ;;  %v437_v46 = vmax.f32 %v309_v37, 0.0  ;;  %v311_v47 = vadd.f32 0.5, %v183_v38  ;;  %v184_v48 = vmul.f32 0.16666667, %v1057_v27 }
  0x2c   :  { %v689_v41 = vmul.f32 %v561_v36, %v1036_v54  ;;  %v690_v49 = vmul.f32 %v562_v40, %v1038_v59  ;;  %v563_v50 = vmin.f32 %v435_v42, 1.0  ;;  %v438_v51 = vmax.f32 %v310_v43, 0.0  ;;  %v1099_v37 = vld [vmem:[#allocation2 + $0x150] sm:$0xff]  ;;  %v1101_v43 = vld [vmem:[#allocation2 + $0x158] sm:$0xff] }
  0x2d   :  { %v564_v53 = vmin.f32 %v436_v45, 1.0  ;;  %v565_v55 = vmin.f32 %v437_v46, 1.0  ;;  %v439_v56 = vmax.f32 %v311_v47, 0.0  ;;  %v312_v57 = vadd.f32 0.5, %v184_v48  ;;  %v1103_v45 = vld [vmem:[#allocation2 + $0x160] sm:$0xff] }
  0x2e   :  { %817 = vst [vmem:[#allocation5 + $0xc0] sm:$0xff] %v689_v41  ;;  %v691_v61 = vmul.f32 %v563_v50, %v1043_v4  ;;  %v566_v63 = vmin.f32 %v438_v51, 1.0  ;;  %v185_v54 = vmul.f32 0.16666667, %v1064_v39  ;;  %v186_v59 = vmul.f32 0.16666667, %v1066_v44 }
  0x2f   :  { %818 = vst [vmem:[#allocation5 + $0xc8] sm:$0xff] %v690_v49  ;;  %v692_v0 = vmul.f32 %v564_v53, %v1045_v10  ;;  %v693_v62 = vmul.f32 %v565_v55, %v1047_v12  ;;  %v567_v1 = vmin.f32 %v439_v56, 1.0  ;;  %v440_v2 = vmax.f32 %v312_v57, 0.0  ;;  %v70_v51 = vld [vmem:[#allocation2 + $0x168] sm:$0xff]  ;;  %v1110_v53 = vld [vmem:[#allocation2 + $0x170] sm:$0xff] }
  0x30   :  { %819 = vst [vmem:[#allocation5 + $0xd0] sm:$0xff] %v691_v61  ;;  %v694_v7 = vmul.f32 %v566_v63, %v54_v19  ;;  %v313_v8 = vadd.f32 0.5, %v185_v54  ;;  %v314_v9 = vadd.f32 0.5, %v186_v59  ;;  %v187_v4 = vmul.f32 0.16666667, %v1071_v52  ;;  %v1113_v61 = vld [vmem:[#allocation2 + $0x178] sm:$0xff] }
  0x31   :  { %820 = vst [vmem:[#allocation5 + $0xd8] sm:$0xff] %v692_v0  ;;  %v695_v14 = vmul.f32 %v567_v1, %v1054_v21  ;;  %v568_v6 = vmin.f32 %v440_v2, 1.0  ;;  %v188_v10 = vmul.f32 0.16666667, %v1073_v58  ;;  %v189_v12 = vmul.f32 0.16666667, %v1075_v60 }
  0x32   :  { %821 = vst [vmem:[#allocation5 + $0xe0] sm:$0xff] %v693_v62  ;;  %v441_v11 = vmax.f32 %v313_v8, 0.0  ;;  %v442_v15 = vmax.f32 %v314_v9, 0.0  ;;  %v315_v16 = vadd.f32 0.5, %v187_v4  ;;  %v190_v17 = vmul.f32 0.16666667, %v62_v3 }
  0x33   :  { %822 = vst [vmem:[#allocation5 + $0xe8] sm:$0xff] %v694_v7  ;;  %v696_v18 = vmul.f32 %v568_v6, %v1057_v27  ;;  %v316_v19 = vadd.f32 0.5, %v188_v10  ;;  %v317_v22 = vadd.f32 0.5, %v189_v12  ;;  %v191_v23 = vmul.f32 0.16666667, %v1082_v5  ;;  %v1120_v9 = vld [vmem:[#allocation2 + $0x180] sm:$0xff] }
  0x34   :  { %823 = vst [vmem:[#allocation5 + $0xf0] sm:$0xff] %v695_v14  ;;  %v569_v21 = vmin.f32 %v441_v11, 1.0  ;;  %v570_v20 = vmin.f32 %v442_v15, 1.0  ;;  %v443_v28 = vmax.f32 %v315_v16, 0.0  ;;  %v318_v29 = vadd.f32 0.5, %v190_v17  ;;  %v1122_v10 = vld [vmem:[#allocation2 + $0x188] sm:$0xff] }
  0x35   :  { %824 = vst [vmem:[#allocation5 + $0xf8] sm:$0xff] %v696_v18  ;;  %v444_v26 = vmax.f32 %v316_v19, 0.0  ;;  %v445_v30 = vmax.f32 %v317_v22, 0.0  ;;  %v319_v31 = vadd.f32 0.5, %v191_v23  ;;  %v192_v32 = vmul.f32 0.16666667, %v1085_v13 }
  0x36   :  { %v697_v27 = vmul.f32 %v569_v21, %v1064_v39  ;;  %v698_v33 = vmul.f32 %v570_v20, %v1066_v44  ;;  %v571_v34 = vmin.f32 %v443_v28, 1.0  ;;  %v446_v35 = vmax.f32 %v318_v29, 0.0  ;;  %v1127_v22 = vld [vmem:[#allocation2 + $0x190] sm:$0xff]  ;;  %v1129_v29 = vld [vmem:[#allocation2 + $0x198] sm:$0xff] }
  0x37   :  { %v572_v38 = vmin.f32 %v444_v26, 1.0  ;;  %v573_v36 = vmin.f32 %v445_v30, 1.0  ;;  %v447_v40 = vmax.f32 %v319_v31, 0.0  ;;  %v320_v42 = vadd.f32 0.5, %v192_v32  ;;  %v1131_v26 = vld [vmem:[#allocation2 + $0x1a0] sm:$0xff] }
  0x38   :  { %825 = vst [vmem:[#allocation5 + $0x100] sm:$0xff] %v697_v27  ;;  %v699_v46 = vmul.f32 %v571_v34, %v1071_v52  ;;  %v574_v47 = vmin.f32 %v446_v35, 1.0  ;;  %v193_v39 = vmul.f32 0.16666667, %v1092_v24  ;;  %v194_v44 = vmul.f32 0.16666667, %v1094_v25 }
  0x39   :  { %826 = vst [vmem:[#allocation5 + $0x108] sm:$0xff] %v698_v33  ;;  %v700_v48 = vmul.f32 %v572_v38, %v1073_v58  ;;  %v701_v41 = vmul.f32 %v573_v36, %v1075_v60  ;;  %v575_v49 = vmin.f32 %v447_v40, 1.0  ;;  %v448_v50 = vmax.f32 %v320_v42, 0.0  ;;  %v78_v35 = vld [vmem:[#allocation2 + $0x1a8] sm:$0xff]  ;;  %v1138_v38 = vld [vmem:[#allocation2 + $0x1b0] sm:$0xff] }
  0x3a   :  { %827 = vst [vmem:[#allocation5 + $0x110] sm:$0xff] %v699_v46  ;;  %v702_v55 = vmul.f32 %v574_v47, %v62_v3  ;;  %v321_v56 = vadd.f32 0.5, %v193_v39  ;;  %v322_v57 = vadd.f32 0.5, %v194_v44  ;;  %v195_v52 = vmul.f32 0.16666667, %v1099_v37  ;;  %v1141_v46 = vld [vmem:[#allocation2 + $0x1b8] sm:$0xff] }
  0x3b   :  { %828 = vst [vmem:[#allocation5 + $0x118] sm:$0xff] %v700_v48  ;;  %v703_v63 = vmul.f32 %v575_v49, %v1082_v5  ;;  %v576_v54 = vmin.f32 %v448_v50, 1.0  ;;  %v196_v58 = vmul.f32 0.16666667, %v1101_v43  ;;  %v197_v60 = vmul.f32 0.16666667, %v1103_v45 }
  0x3c   :  { %829 = vst [vmem:[#allocation5 + $0x120] sm:$0xff] %v701_v41  ;;  %v449_v59 = vmax.f32 %v321_v56, 0.0  ;;  %v450_v0 = vmax.f32 %v322_v57, 0.0  ;;  %v323_v62 = vadd.f32 0.5, %v195_v52  ;;  %v198_v1 = vmul.f32 0.16666667, %v70_v51 }
  0x3d   :  { %830 = vst [vmem:[#allocation5 + $0x128] sm:$0xff] %v702_v55  ;;  %v704_v2 = vmul.f32 %v576_v54, %v1085_v13  ;;  %v324_v3 = vadd.f32 0.5, %v196_v58  ;;  %v325_v7 = vadd.f32 0.5, %v197_v60  ;;  %v199_v8 = vmul.f32 0.16666667, %v1110_v53  ;;  %v1148_v57 = vld [vmem:[#allocation2 + $0x1c0] sm:$0xff] }
  0x3e   :  { %831 = vst [vmem:[#allocation5 + $0x130] sm:$0xff] %v703_v63  ;;  %v577_v5 = vmin.f32 %v449_v59, 1.0  ;;  %v578_v4 = vmin.f32 %v450_v0, 1.0  ;;  %v451_v14 = vmax.f32 %v323_v62, 0.0  ;;  %v326_v6 = vadd.f32 0.5, %v198_v1  ;;  %v1150_v58 = vld [vmem:[#allocation2 + $0x1c8] sm:$0xff] }
  0x3f   :  { %832 = vst [vmem:[#allocation5 + $0x138] sm:$0xff] %v704_v2  ;;  %v452_v12 = vmax.f32 %v324_v3, 0.0  ;;  %v453_v11 = vmax.f32 %v325_v7, 0.0  ;;  %v327_v15 = vadd.f32 0.5, %v199_v8  ;;  %v200_v16 = vmul.f32 0.16666667, %v1113_v61 }
  0x40   :  { %v705_v13 = vmul.f32 %v577_v5, %v1092_v24  ;;  %v706_v17 = vmul.f32 %v578_v4, %v1094_v25  ;;  %v579_v18 = vmin.f32 %v451_v14, 1.0  ;;  %v454_v19 = vmax.f32 %v326_v6, 0.0  ;;  %v1155_v7 = vld [vmem:[#allocation2 + $0x1d0] sm:$0xff]  ;;  %v1157_v6 = vld [vmem:[#allocation2 + $0x1d8] sm:$0xff] }
  0x41   :  { %v580_v23 = vmin.f32 %v452_v12, 1.0  ;;  %v581_v21 = vmin.f32 %v453_v11, 1.0  ;;  %v455_v20 = vmax.f32 %v327_v15, 0.0  ;;  %v328_v28 = vadd.f32 0.5, %v200_v16  ;;  %v1159_v12 = vld [vmem:[#allocation2 + $0x1e0] sm:$0xff] }
  0x42   :  { %833 = vst [vmem:[#allocation5 + $0x140] sm:$0xff] %v705_v13  ;;  %v707_v30 = vmul.f32 %v579_v18, %v1099_v37  ;;  %v582_v31 = vmin.f32 %v454_v19, 1.0  ;;  %v201_v24 = vmul.f32 0.16666667, %v1120_v9  ;;  %v202_v25 = vmul.f32 0.16666667, %v1122_v10 }
  0x43   :  { %834 = vst [vmem:[#allocation5 + $0x148] sm:$0xff] %v706_v17  ;;  %v708_v32 = vmul.f32 %v580_v23, %v1101_v43  ;;  %v709_v27 = vmul.f32 %v581_v21, %v1103_v45  ;;  %v583_v33 = vmin.f32 %v455_v20, 1.0  ;;  %v456_v34 = vmax.f32 %v328_v28, 0.0  ;;  %v86_v19 = vld [vmem:[#allocation2 + $0x1e8] sm:$0xff]  ;;  %v1166_v23 = vld [vmem:[#allocation2 + $0x1f0] sm:$0xff] }
  0x44   :  { %835 = vst [vmem:[#allocation5 + $0x150] sm:$0xff] %v707_v30  ;;  %v710_v36 = vmul.f32 %v582_v31, %v70_v51  ;;  %v329_v40 = vadd.f32 0.5, %v201_v24  ;;  %v330_v42 = vadd.f32 0.5, %v202_v25  ;;  %v203_v37 = vmul.f32 0.16666667, %v1127_v22  ;;  %v1169_v30 = vld [vmem:[#allocation2 + $0x1f8] sm:$0xff] }
  0x45   :  { %836 = vst [vmem:[#allocation5 + $0x158] sm:$0xff] %v708_v32  ;;  %v711_v47 = vmul.f32 %v583_v33, %v1110_v53  ;;  %v584_v39 = vmin.f32 %v456_v34, 1.0  ;;  %v204_v43 = vmul.f32 0.16666667, %v1129_v29  ;;  %v205_v45 = vmul.f32 0.16666667, %v1131_v26 }
  0x46   :  { %837 = vst [vmem:[#allocation5 + $0x160] sm:$0xff] %v709_v27  ;;  %v457_v44 = vmax.f32 %v329_v40, 0.0  ;;  %v458_v48 = vmax.f32 %v330_v42, 0.0  ;;  %v331_v41 = vadd.f32 0.5, %v203_v37  ;;  %v206_v49 = vmul.f32 0.16666667, %v78_v35 }
  0x47   :  { %838 = vst [vmem:[#allocation5 + $0x168] sm:$0xff] %v710_v36  ;;  %v712_v50 = vmul.f32 %v584_v39, %v1113_v61  ;;  %v332_v51 = vadd.f32 0.5, %v204_v43  ;;  %v333_v55 = vadd.f32 0.5, %v205_v45  ;;  %v207_v56 = vmul.f32 0.16666667, %v1138_v38  ;;  %v1176_v42 = vld [vmem:[#allocation2 + $0x200] sm:$0xff] }
  0x48   :  { %839 = vst [vmem:[#allocation5 + $0x170] sm:$0xff] %v711_v47  ;;  %v585_v53 = vmin.f32 %v457_v44, 1.0  ;;  %v586_v52 = vmin.f32 %v458_v48, 1.0  ;;  %v459_v63 = vmax.f32 %v331_v41, 0.0  ;;  %v334_v54 = vadd.f32 0.5, %v206_v49  ;;  %v1178_v43 = vld [vmem:[#allocation2 + $0x208] sm:$0xff] }
  0x49   :  { %840 = vst [vmem:[#allocation5 + $0x178] sm:$0xff] %v712_v50  ;;  %v460_v60 = vmax.f32 %v332_v51, 0.0  ;;  %v461_v59 = vmax.f32 %v333_v55, 0.0  ;;  %v335_v0 = vadd.f32 0.5, %v207_v56  ;;  %v208_v62 = vmul.f32 0.16666667, %v1141_v46 }
  0x4a   :  { %v713_v61 = vmul.f32 %v585_v53, %v1120_v9  ;;  %v714_v1 = vmul.f32 %v586_v52, %v1122_v10  ;;  %v587_v2 = vmin.f32 %v459_v63, 1.0  ;;  %v462_v3 = vmax.f32 %v334_v54, 0.0  ;;  %v1183_v55 = vld [vmem:[#allocation2 + $0x210] sm:$0xff]  ;;  %v1185_v54 = vld [vmem:[#allocation2 + $0x218] sm:$0xff] }
  0x4b   :  { %v588_v8 = vmin.f32 %v460_v60, 1.0  ;;  %v589_v5 = vmin.f32 %v461_v59, 1.0  ;;  %v463_v4 = vmax.f32 %v335_v0, 0.0  ;;  %v336_v14 = vadd.f32 0.5, %v208_v62  ;;  %v1187_v60 = vld [vmem:[#allocation2 + $0x220] sm:$0xff] }
  0x4c   :  { %841 = vst [vmem:[#allocation5 + $0x180] sm:$0xff] %v713_v61  ;;  %v715_v11 = vmul.f32 %v587_v2, %v1127_v22  ;;  %v590_v15 = vmin.f32 %v462_v3, 1.0  ;;  %v209_v9 = vmul.f32 0.16666667, %v1148_v57  ;;  %v210_v10 = vmul.f32 0.16666667, %v1150_v58 }
  0x4d   :  { %842 = vst [vmem:[#allocation5 + $0x188] sm:$0xff] %v714_v1  ;;  %v716_v16 = vmul.f32 %v588_v8, %v1129_v29  ;;  %v717_v13 = vmul.f32 %v589_v5, %v1131_v26  ;;  %v591_v17 = vmin.f32 %v463_v4, 1.0  ;;  %v464_v18 = vmax.f32 %v336_v14, 0.0  ;;  %v94_v3 = vld [vmem:[#allocation2 + $0x228] sm:$0xff]  ;;  %v1194_v8 = vld [vmem:[#allocation2 + $0x230] sm:$0xff] }
  0x4e   :  { %843 = vst [vmem:[#allocation5 + $0x190] sm:$0xff] %v715_v11  ;;  %v718_v21 = vmul.f32 %v590_v15, %v78_v35  ;;  %v337_v20 = vadd.f32 0.5, %v209_v9  ;;  %v338_v28 = vadd.f32 0.5, %v210_v10  ;;  %v211_v22 = vmul.f32 0.16666667, %v1155_v7  ;;  %v1197_v11 = vld [vmem:[#allocation2 + $0x238] sm:$0xff] }
  0x4f   :  { %844 = vst [vmem:[#allocation5 + $0x198] sm:$0xff] %v716_v16  ;;  %v719_v31 = vmul.f32 %v591_v17, %v1138_v38  ;;  %v592_v24 = vmin.f32 %v464_v18, 1.0  ;;  %v212_v29 = vmul.f32 0.16666667, %v1157_v6  ;;  %v213_v26 = vmul.f32 0.16666667, %v1159_v12 }
  0x50   :  { %845 = vst [vmem:[#allocation5 + $0x1a0] sm:$0xff] %v717_v13  ;;  %v465_v25 = vmax.f32 %v337_v20, 0.0  ;;  %v466_v32 = vmax.f32 %v338_v28, 0.0  ;;  %v339_v27 = vadd.f32 0.5, %v211_v22  ;;  %v214_v33 = vmul.f32 0.16666667, %v86_v19 }
  0x51   :  { %846 = vst [vmem:[#allocation5 + $0x1a8] sm:$0xff] %v718_v21  ;;  %v720_v34 = vmul.f32 %v592_v24, %v1141_v46  ;;  %v340_v35 = vadd.f32 0.5, %v212_v29  ;;  %v341_v36 = vadd.f32 0.5, %v213_v26  ;;  %v215_v40 = vmul.f32 0.16666667, %v1166_v23  ;;  %v1204_v28 = vld [vmem:[#allocation2 + $0x240] sm:$0xff] }
  0x52   :  { %847 = vst [vmem:[#allocation5 + $0x1b0] sm:$0xff] %v719_v31  ;;  %v593_v38 = vmin.f32 %v465_v25, 1.0  ;;  %v594_v37 = vmin.f32 %v466_v32, 1.0  ;;  %v467_v47 = vmax.f32 %v339_v27, 0.0  ;;  %v342_v39 = vadd.f32 0.5, %v214_v33  ;;  %v1206_v29 = vld [vmem:[#allocation2 + $0x248] sm:$0xff] }
  0x53   :  { %848 = vst [vmem:[#allocation5 + $0x1b8] sm:$0xff] %v720_v34  ;;  %v468_v45 = vmax.f32 %v340_v35, 0.0  ;;  %v469_v44 = vmax.f32 %v341_v36, 0.0  ;;  %v343_v48 = vadd.f32 0.5, %v215_v40  ;;  %v216_v41 = vmul.f32 0.16666667, %v1169_v30 }
  0x54   :  { %v721_v46 = vmul.f32 %v593_v38, %v1148_v57  ;;  %v722_v49 = vmul.f32 %v594_v37, %v1150_v58  ;;  %v595_v50 = vmin.f32 %v467_v47, 1.0  ;;  %v470_v51 = vmax.f32 %v342_v39, 0.0  ;;  %v1211_v36 = vld [vmem:[#allocation2 + $0x250] sm:$0xff]  ;;  %v1213_v39 = vld [vmem:[#allocation2 + $0x258] sm:$0xff] }
  0x55   :  { %v596_v56 = vmin.f32 %v468_v45, 1.0  ;;  %v597_v53 = vmin.f32 %v469_v44, 1.0  ;;  %v471_v52 = vmax.f32 %v343_v48, 0.0  ;;  %v344_v63 = vadd.f32 0.5, %v216_v41  ;;  %v1215_v45 = vld [vmem:[#allocation2 + $0x260] sm:$0xff] }
  0x56   :  { %849 = vst [vmem:[#allocation5 + $0x1c0] sm:$0xff] %v721_v46  ;;  %v723_v59 = vmul.f32 %v595_v50, %v1155_v7  ;;  %v598_v0 = vmin.f32 %v470_v51, 1.0  ;;  %v217_v57 = vmul.f32 0.16666667, %v1176_v42  ;;  %v218_v58 = vmul.f32 0.16666667, %v1178_v43 }
  0x57   :  { %850 = vst [vmem:[#allocation5 + $0x1c8] sm:$0xff] %v722_v49  ;;  %v724_v62 = vmul.f32 %v596_v56, %v1157_v6  ;;  %v725_v61 = vmul.f32 %v597_v53, %v1159_v12  ;;  %v599_v1 = vmin.f32 %v471_v52, 1.0  ;;  %v472_v2 = vmax.f32 %v344_v63, 0.0  ;;  %v102_v51 = vld [vmem:[#allocation2 + $0x268] sm:$0xff]  ;;  %v1222_v56 = vld [vmem:[#allocation2 + $0x270] sm:$0xff] }
  0x58   :  { %851 = vst [vmem:[#allocation5 + $0x1d0] sm:$0xff] %v723_v59  ;;  %v726_v5 = vmul.f32 %v598_v0, %v86_v19  ;;  %v345_v4 = vadd.f32 0.5, %v217_v57  ;;  %v346_v14 = vadd.f32 0.5, %v218_v58  ;;  %v219_v7 = vmul.f32 0.16666667, %v1183_v55  ;;  %v1225_v59 = vld [vmem:[#allocation2 + $0x278] sm:$0xff] }
  0x59   :  { %852 = vst [vmem:[#allocation5 + $0x1d8] sm:$0xff] %v724_v62  ;;  %v727_v15 = vmul.f32 %v599_v1, %v1166_v23  ;;  %v600_v9 = vmin.f32 %v472_v2, 1.0  ;;  %v220_v6 = vmul.f32 0.16666667, %v1185_v54  ;;  %v221_v12 = vmul.f32 0.16666667, %v1187_v60 }
  0x5a   :  { %853 = vst [vmem:[#allocation5 + $0x1e0] sm:$0xff] %v725_v61  ;;  %v473_v10 = vmax.f32 %v345_v4, 0.0  ;;  %v474_v16 = vmax.f32 %v346_v14, 0.0  ;;  %v347_v13 = vadd.f32 0.5, %v219_v7  ;;  %v222_v17 = vmul.f32 0.16666667, %v94_v3 }
  0x5b   :  { %854 = vst [vmem:[#allocation5 + $0x1e8] sm:$0xff] %v726_v5  ;;  %v728_v18 = vmul.f32 %v600_v9, %v1169_v30  ;;  %v348_v19 = vadd.f32 0.5, %v220_v6  ;;  %v349_v21 = vadd.f32 0.5, %v221_v12  ;;  %v223_v20 = vmul.f32 0.16666667, %v1194_v8  ;;  %v1232_v14 = vld [vmem:[#allocation2 + $0x280] sm:$0xff] }
  0x5c   :  { %855 = vst [vmem:[#allocation5 + $0x1f0] sm:$0xff] %v727_v15  ;;  %v601_v23 = vmin.f32 %v473_v10, 1.0  ;;  %v602_v22 = vmin.f32 %v474_v16, 1.0  ;;  %v475_v31 = vmax.f32 %v347_v13, 0.0  ;;  %v350_v24 = vadd.f32 0.5, %v222_v17  ;;  %v1234_v6 = vld [vmem:[#allocation2 + $0x288] sm:$0xff] }
  0x5d   :  { %856 = vst [vmem:[#allocation5 + $0x1f8] sm:$0xff] %v728_v18  ;;  %v476_v26 = vmax.f32 %v348_v19, 0.0  ;;  %v477_v25 = vmax.f32 %v349_v21, 0.0  ;;  %v351_v32 = vadd.f32 0.5, %v223_v20  ;;  %v224_v27 = vmul.f32 0.16666667, %v1197_v11 }
  0x5e   :  { %v729_v30 = vmul.f32 %v601_v23, %v1176_v42  ;;  %v730_v33 = vmul.f32 %v602_v22, %v1178_v43  ;;  %v603_v34 = vmin.f32 %v475_v31, 1.0  ;;  %v478_v35 = vmax.f32 %v350_v24, 0.0  ;;  %v1239_v21 = vld [vmem:[#allocation2 + $0x290] sm:$0xff]  ;;  %v1241_v24 = vld [vmem:[#allocation2 + $0x298] sm:$0xff] }
  0x5f   :  { %v604_v40 = vmin.f32 %v476_v26, 1.0  ;;  %v605_v38 = vmin.f32 %v477_v25, 1.0  ;;  %v479_v37 = vmax.f32 %v351_v32, 0.0  ;;  %v352_v47 = vadd.f32 0.5, %v224_v27  ;;  %v1243_v26 = vld [vmem:[#allocation2 + $0x2a0] sm:$0xff] }
  0x60   :  { %857 = vst [vmem:[#allocation5 + $0x200] sm:$0xff] %v729_v30  ;;  %v731_v44 = vmul.f32 %v603_v34, %v1183_v55  ;;  %v606_v48 = vmin.f32 %v478_v35, 1.0  ;;  %v225_v42 = vmul.f32 0.16666667, %v1204_v28  ;;  %v226_v43 = vmul.f32 0.16666667, %v1206_v29 }
  0x61   :  { %858 = vst [vmem:[#allocation5 + $0x208] sm:$0xff] %v730_v33  ;;  %v732_v41 = vmul.f32 %v604_v40, %v1185_v54  ;;  %v733_v46 = vmul.f32 %v605_v38, %v1187_v60  ;;  %v607_v49 = vmin.f32 %v479_v37, 1.0  ;;  %v480_v50 = vmax.f32 %v352_v47, 0.0  ;;  %v110_v35 = vld [vmem:[#allocation2 + $0x2a8] sm:$0xff]  ;;  %v1250_v40 = vld [vmem:[#allocation2 + $0x2b0] sm:$0xff] }
  0x62   :  { %859 = vst [vmem:[#allocation5 + $0x210] sm:$0xff] %v731_v44  ;;  %v734_v53 = vmul.f32 %v606_v48, %v94_v3  ;;  %v353_v52 = vadd.f32 0.5, %v225_v42  ;;  %v354_v63 = vadd.f32 0.5, %v226_v43  ;;  %v227_v55 = vmul.f32 0.16666667, %v1211_v36  ;;  %v1253_v44 = vld [vmem:[#allocation2 + $0x2b8] sm:$0xff] }
  0x63   :  { %860 = vst [vmem:[#allocation5 + $0x218] sm:$0xff] %v732_v41  ;;  %v735_v0 = vmul.f32 %v607_v49, %v1194_v8  ;;  %v608_v57 = vmin.f32 %v480_v50, 1.0  ;;  %v228_v54 = vmul.f32 0.16666667, %v1213_v39  ;;  %v229_v60 = vmul.f32 0.16666667, %v1215_v45 }
  0x64   :  { %861 = vst [vmem:[#allocation5 + $0x220] sm:$0xff] %v733_v46  ;;  %v481_v58 = vmax.f32 %v353_v52, 0.0  ;;  %v482_v62 = vmax.f32 %v354_v63, 0.0  ;;  %v355_v61 = vadd.f32 0.5, %v227_v55  ;;  %v230_v1 = vmul.f32 0.16666667, %v102_v51 }
  0x65   :  { %862 = vst [vmem:[#allocation5 + $0x228] sm:$0xff] %v734_v53  ;;  %v736_v2 = vmul.f32 %v608_v57, %v1197_v11  ;;  %v356_v3 = vadd.f32 0.5, %v228_v54  ;;  %v357_v5 = vadd.f32 0.5, %v229_v60  ;;  %v231_v4 = vmul.f32 0.16666667, %v1222_v56  ;;  %v1260_v63 = vld [vmem:[#allocation2 + $0x2c0] sm:$0xff] }
  0x66   :  { %863 = vst [vmem:[#allocation5 + $0x230] sm:$0xff] %v735_v0  ;;  %v609_v8 = vmin.f32 %v481_v58, 1.0  ;;  %v610_v7 = vmin.f32 %v482_v62, 1.0  ;;  %v483_v15 = vmax.f32 %v355_v61, 0.0  ;;  %v358_v9 = vadd.f32 0.5, %v230_v1  ;;  %v1262_v54 = vld [vmem:[#allocation2 + $0x2c8] sm:$0xff] }
  0x67   :  { %864 = vst [vmem:[#allocation5 + $0x238] sm:$0xff] %v736_v2  ;;  %v484_v12 = vmax.f32 %v356_v3, 0.0  ;;  %v485_v10 = vmax.f32 %v357_v5, 0.0  ;;  %v359_v16 = vadd.f32 0.5, %v231_v4  ;;  %v232_v13 = vmul.f32 0.16666667, %v1225_v59 }
  0x68   :  { %v737_v11 = vmul.f32 %v609_v8, %v1204_v28  ;;  %v738_v17 = vmul.f32 %v610_v7, %v1206_v29  ;;  %v611_v18 = vmin.f32 %v483_v15, 1.0  ;;  %v486_v19 = vmax.f32 %v358_v9, 0.0  ;;  %v1267_v5 = vld [vmem:[#allocation2 + $0x2d0] sm:$0xff]  ;;  %v1269_v9 = vld [vmem:[#allocation2 + $0x2d8] sm:$0xff] }
  0x69   :  { %v612_v20 = vmin.f32 %v484_v12, 1.0  ;;  %v613_v23 = vmin.f32 %v485_v10, 1.0  ;;  %v487_v22 = vmax.f32 %v359_v16, 0.0  ;;  %v360_v31 = vadd.f32 0.5, %v232_v13  ;;  %v1271_v12 = vld [vmem:[#allocation2 + $0x2e0] sm:$0xff] }
  0x6a   :  { %865 = vst [vmem:[#allocation5 + $0x240] sm:$0xff] %v737_v11  ;;  %v739_v25 = vmul.f32 %v611_v18, %v1211_v36  ;;  %v614_v32 = vmin.f32 %v486_v19, 1.0  ;;  %v233_v28 = vmul.f32 0.16666667, %v1232_v14  ;;  %v234_v29 = vmul.f32 0.16666667, %v1234_v6 }
  0x6b   :  { %866 = vst [vmem:[#allocation5 + $0x248] sm:$0xff] %v738_v17  ;;  %v740_v27 = vmul.f32 %v612_v20, %v1213_v39  ;;  %v741_v30 = vmul.f32 %v613_v23, %v1215_v45  ;;  %v615_v33 = vmin.f32 %v487_v22, 1.0  ;;  %v488_v34 = vmax.f32 %v360_v31, 0.0  ;;  %v118_v19 = vld [vmem:[#allocation2 + $0x2e8] sm:$0xff]  ;;  %v1278_v20 = vld [vmem:[#allocation2 + $0x2f0] sm:$0xff] }
  0x6c   :  { %867 = vst [vmem:[#allocation5 + $0x250] sm:$0xff] %v739_v25  ;;  %v742_v38 = vmul.f32 %v614_v32, %v102_v51  ;;  %v361_v37 = vadd.f32 0.5, %v233_v28  ;;  %v362_v47 = vadd.f32 0.5, %v234_v29  ;;  %v235_v36 = vmul.f32 0.16666667, %v1239_v21  ;;  %v1281_v25 = vld [vmem:[#allocation2 + $0x2f8] sm:$0xff] }
  0x6d   :  { %868 = vst [vmem:[#allocation5 + $0x258] sm:$0xff] %v740_v27  ;;  %v743_v48 = vmul.f32 %v615_v33, %v1222_v56  ;;  %v616_v42 = vmin.f32 %v488_v34, 1.0  ;;  %v236_v39 = vmul.f32 0.16666667, %v1241_v24  ;;  %v237_v45 = vmul.f32 0.16666667, %v1243_v26 }
  0x6e   :  { %869 = vst [vmem:[#allocation5 + $0x260] sm:$0xff] %v741_v30  ;;  %v489_v43 = vmax.f32 %v361_v37, 0.0  ;;  %v490_v41 = vmax.f32 %v362_v47, 0.0  ;;  %v363_v46 = vadd.f32 0.5, %v235_v36  ;;  %v238_v49 = vmul.f32 0.16666667, %v110_v35 }
  0x6f   :  { %870 = vst [vmem:[#allocation5 + $0x268] sm:$0xff] %v742_v38  ;;  %v744_v50 = vmul.f32 %v616_v42, %v1225_v59  ;;  %v364_v51 = vadd.f32 0.5, %v236_v39  ;;  %v365_v53 = vadd.f32 0.5, %v237_v45  ;;  %v239_v52 = vmul.f32 0.16666667, %v1250_v40  ;;  %v1288_v47 = vld [vmem:[#allocation2 + $0x300] sm:$0xff] }
  0x70   :  { %871 = vst [vmem:[#allocation5 + $0x270] sm:$0xff] %v743_v48  ;;  %v617_v56 = vmin.f32 %v489_v43, 1.0  ;;  %v618_v55 = vmin.f32 %v490_v41, 1.0  ;;  %v491_v0 = vmax.f32 %v363_v46, 0.0  ;;  %v366_v57 = vadd.f32 0.5, %v238_v49  ;;  %v1290_v39 = vld [vmem:[#allocation2 + $0x308] sm:$0xff] }
  0x71   :  { %872 = vst [vmem:[#allocation5 + $0x278] sm:$0xff] %v744_v50  ;;  %v492_v60 = vmax.f32 %v364_v51, 0.0  ;;  %v493_v58 = vmax.f32 %v365_v53, 0.0  ;;  %v367_v62 = vadd.f32 0.5, %v239_v52  ;;  %v240_v61 = vmul.f32 0.16666667, %v1253_v44 }
  0x72   :  { %v745_v59 = vmul.f32 %v617_v56, %v1232_v14  ;;  %v746_v1 = vmul.f32 %v618_v55, %v1234_v6  ;;  %v619_v2 = vmin.f32 %v491_v0, 1.0  ;;  %v494_v3 = vmax.f32 %v366_v57, 0.0  ;;  %v1295_v53 = vld [vmem:[#allocation2 + $0x310] sm:$0xff]  ;;  %v1297_v57 = vld [vmem:[#allocation2 + $0x318] sm:$0xff] }
  0x73   :  { %v620_v4 = vmin.f32 %v492_v60, 1.0  ;;  %v621_v8 = vmin.f32 %v493_v58, 1.0  ;;  %v495_v7 = vmax.f32 %v367_v62, 0.0  ;;  %v368_v15 = vadd.f32 0.5, %v240_v61  ;;  %v1299_v60 = vld [vmem:[#allocation2 + $0x320] sm:$0xff] }
  0x74   :  { %873 = vst [vmem:[#allocation5 + $0x280] sm:$0xff] %v745_v59  ;;  %v747_v10 = vmul.f32 %v619_v2, %v1239_v21  ;;  %v622_v16 = vmin.f32 %v494_v3, 1.0  ;;  %v241_v14 = vmul.f32 0.16666667, %v1260_v63  ;;  %v242_v6 = vmul.f32 0.16666667, %v1262_v54 }
  0x75   :  { %874 = vst [vmem:[#allocation5 + $0x288] sm:$0xff] %v746_v1  ;;  %v748_v13 = vmul.f32 %v620_v4, %v1241_v24  ;;  %v749_v11 = vmul.f32 %v621_v8, %v1243_v26  ;;  %v623_v17 = vmin.f32 %v495_v7, 1.0  ;;  %v496_v18 = vmax.f32 %v368_v15, 0.0  ;;  %v126_v3 = vld [vmem:[#allocation2 + $0x328] sm:$0xff]  ;;  %v1306_v4 = vld [vmem:[#allocation2 + $0x330] sm:$0xff] }
  0x76   :  { %875 = vst [vmem:[#allocation5 + $0x290] sm:$0xff] %v747_v10  ;;  %v750_v23 = vmul.f32 %v622_v16, %v110_v35  ;;  %v369_v22 = vadd.f32 0.5, %v241_v14  ;;  %v370_v31 = vadd.f32 0.5, %v242_v6  ;;  %v243_v21 = vmul.f32 0.16666667, %v1267_v5  ;;  %v1309_v10 = vld [vmem:[#allocation2 + $0x338] sm:$0xff] }
  0x77   :  { %876 = vst [vmem:[#allocation5 + $0x298] sm:$0xff] %v748_v13  ;;  %v751_v32 = vmul.f32 %v623_v17, %v1250_v40  ;;  %v624_v28 = vmin.f32 %v496_v18, 1.0  ;;  %v244_v24 = vmul.f32 0.16666667, %v1269_v9  ;;  %v245_v26 = vmul.f32 0.16666667, %v1271_v12 }
  0x78   :  { %877 = vst [vmem:[#allocation5 + $0x2a0] sm:$0xff] %v749_v11  ;;  %v497_v29 = vmax.f32 %v369_v22, 0.0  ;;  %v498_v27 = vmax.f32 %v370_v31, 0.0  ;;  %v371_v30 = vadd.f32 0.5, %v243_v21  ;;  %v246_v33 = vmul.f32 0.16666667, %v118_v19 }
  0x79   :  { %878 = vst [vmem:[#allocation5 + $0x2a8] sm:$0xff] %v750_v23  ;;  %v752_v34 = vmul.f32 %v624_v28, %v1253_v44  ;;  %v372_v35 = vadd.f32 0.5, %v244_v24  ;;  %v373_v38 = vadd.f32 0.5, %v245_v26  ;;  %v247_v37 = vmul.f32 0.16666667, %v1278_v20  ;;  %v1316_v31 = vld [vmem:[#allocation2 + $0x340] sm:$0xff] }
  0x7a   :  { %879 = vst [vmem:[#allocation5 + $0x2b0] sm:$0xff] %v751_v32  ;;  %v625_v40 = vmin.f32 %v497_v29, 1.0  ;;  %v626_v36 = vmin.f32 %v498_v27, 1.0  ;;  %v499_v48 = vmax.f32 %v371_v30, 0.0  ;;  %v374_v42 = vadd.f32 0.5, %v246_v33  ;;  %v1318_v24 = vld [vmem:[#allocation2 + $0x348] sm:$0xff] }
  0x7b   :  { %880 = vst [vmem:[#allocation5 + $0x2b8] sm:$0xff] %v752_v34  ;;  %v500_v45 = vmax.f32 %v372_v35, 0.0  ;;  %v501_v43 = vmax.f32 %v373_v38, 0.0  ;;  %v375_v41 = vadd.f32 0.5, %v247_v37  ;;  %v248_v46 = vmul.f32 0.16666667, %v1281_v25 }
  0x7c   :  { %v753_v44 = vmul.f32 %v625_v40, %v1260_v63  ;;  %v754_v49 = vmul.f32 %v626_v36, %v1262_v54  ;;  %v627_v50 = vmin.f32 %v499_v48, 1.0  ;;  %v502_v51 = vmax.f32 %v374_v42, 0.0  ;;  %v1323_v38 = vld [vmem:[#allocation2 + $0x350] sm:$0xff]  ;;  %v1325_v42 = vld [vmem:[#allocation2 + $0x358] sm:$0xff] }
  0x7d   :  { %v628_v52 = vmin.f32 %v500_v45, 1.0  ;;  %v629_v56 = vmin.f32 %v501_v43, 1.0  ;;  %v503_v55 = vmax.f32 %v375_v41, 0.0  ;;  %v376_v0 = vadd.f32 0.5, %v248_v46  ;;  %v1327_v45 = vld [vmem:[#allocation2 + $0x360] sm:$0xff] }
  0x7e   :  { %881 = vst [vmem:[#allocation5 + $0x2c0] sm:$0xff] %v753_v44  ;;  %v755_v58 = vmul.f32 %v627_v50, %v1267_v5  ;;  %v630_v62 = vmin.f32 %v502_v51, 1.0  ;;  %v249_v63 = vmul.f32 0.16666667, %v1288_v47  ;;  %v250_v54 = vmul.f32 0.16666667, %v1290_v39 }
  0x7f   :  { %882 = vst [vmem:[#allocation5 + $0x2c8] sm:$0xff] %v754_v49  ;;  %v756_v61 = vmul.f32 %v628_v52, %v1269_v9  ;;  %v757_v59 = vmul.f32 %v629_v56, %v1271_v12  ;;  %v631_v1 = vmin.f32 %v503_v55, 1.0  ;;  %v504_v2 = vmax.f32 %v376_v0, 0.0  ;;  %v134_v51 = vld [vmem:[#allocation2 + $0x368] sm:$0xff]  ;;  %v1334_v52 = vld [vmem:[#allocation2 + $0x370] sm:$0xff] }
  0x80   :  { %883 = vst [vmem:[#allocation5 + $0x2d0] sm:$0xff] %v755_v58  ;;  %v758_v8 = vmul.f32 %v630_v62, %v118_v19  ;;  %v377_v7 = vadd.f32 0.5, %v249_v63  ;;  %v378_v15 = vadd.f32 0.5, %v250_v54  ;;  %v251_v5 = vmul.f32 0.16666667, %v1295_v53  ;;  %v1337_v58 = vld [vmem:[#allocation2 + $0x378] sm:$0xff] }
  0x81   :  { %884 = vst [vmem:[#allocation5 + $0x2d8] sm:$0xff] %v756_v61  ;;  %v759_v16 = vmul.f32 %v631_v1, %v1278_v20  ;;  %v632_v14 = vmin.f32 %v504_v2, 1.0  ;;  %v252_v9 = vmul.f32 0.16666667, %v1297_v57  ;;  %v253_v12 = vmul.f32 0.16666667, %v1299_v60 }
  0x82   :  { %885 = vst [vmem:[#allocation5 + $0x2e0] sm:$0xff] %v757_v59  ;;  %v505_v6 = vmax.f32 %v377_v7, 0.0  ;;  %v506_v13 = vmax.f32 %v378_v15, 0.0  ;;  %v379_v11 = vadd.f32 0.5, %v251_v5  ;;  %v254_v17 = vmul.f32 0.16666667, %v126_v3 }
  0x83   :  { %886 = vst [vmem:[#allocation5 + $0x2e8] sm:$0xff] %v758_v8  ;;  %v760_v18 = vmul.f32 %v632_v14, %v1281_v25  ;;  %v380_v19 = vadd.f32 0.5, %v252_v9  ;;  %v381_v23 = vadd.f32 0.5, %v253_v12  ;;  %v255_v22 = vmul.f32 0.16666667, %v1306_v4  ;;  %v1344_v15 = vld [vmem:[#allocation2 + $0x380] sm:$0xff] }
  0x84   :  { %887 = vst [vmem:[#allocation5 + $0x2f0] sm:$0xff] %v759_v16  ;;  %v633_v20 = vmin.f32 %v505_v6, 1.0  ;;  %v634_v21 = vmin.f32 %v506_v13, 1.0  ;;  %v507_v32 = vmax.f32 %v379_v11, 0.0  ;;  %v382_v28 = vadd.f32 0.5, %v254_v17  ;;  %v1346_v9 = vld [vmem:[#allocation2 + $0x388] sm:$0xff] }
  0x85   :  { %888 = vst [vmem:[#allocation5 + $0x2f8] sm:$0xff] %v760_v18  ;;  %v508_v26 = vmax.f32 %v380_v19, 0.0  ;;  %v509_v29 = vmax.f32 %v381_v23, 0.0  ;;  %v383_v27 = vadd.f32 0.5, %v255_v22  ;;  %v256_v30 = vmul.f32 0.16666667, %v1309_v10 }
  0x86   :  { %v761_v25 = vmul.f32 %v633_v20, %v1288_v47  ;;  %v762_v33 = vmul.f32 %v634_v21, %v1290_v39  ;;  %v635_v34 = vmin.f32 %v507_v32, 1.0  ;;  %v510_v35 = vmax.f32 %v382_v28, 0.0  ;;  %v1351_v23 = vld [vmem:[#allocation2 + $0x390] sm:$0xff]  ;;  %v1353_v28 = vld [vmem:[#allocation2 + $0x398] sm:$0xff] }
  0x87   :  { %v636_v37 = vmin.f32 %v508_v26, 1.0  ;;  %v637_v40 = vmin.f32 %v509_v29, 1.0  ;;  %v511_v36 = vmax.f32 %v383_v27, 0.0  ;;  %v384_v48 = vadd.f32 0.5, %v256_v30  ;;  %v1355_v26 = vld [vmem:[#allocation2 + $0x3a0] sm:$0xff] }
  0x88   :  { %889 = vst [vmem:[#allocation5 + $0x300] sm:$0xff] %v761_v25  ;;  %v763_v43 = vmul.f32 %v635_v34, %v1295_v53  ;;  %v638_v41 = vmin.f32 %v510_v35, 1.0  ;;  %v257_v47 = vmul.f32 0.16666667, %v1316_v31  ;;  %v258_v39 = vmul.f32 0.16666667, %v1318_v24 }
  0x89   :  { %890 = vst [vmem:[#allocation5 + $0x308] sm:$0xff] %v762_v33  ;;  %v764_v46 = vmul.f32 %v636_v37, %v1297_v57  ;;  %v765_v44 = vmul.f32 %v637_v40, %v1299_v60  ;;  %v639_v49 = vmin.f32 %v511_v36, 1.0  ;;  %v512_v50 = vmax.f32 %v384_v48, 0.0  ;;  %v142_v35 = vld [vmem:[#allocation2 + $0x3a8] sm:$0xff]  ;;  %v1362_v37 = vld [vmem:[#allocation2 + $0x3b0] sm:$0xff] }
  0x8a   :  { %891 = vst [vmem:[#allocation5 + $0x310] sm:$0xff] %v763_v43  ;;  %v766_v56 = vmul.f32 %v638_v41, %v126_v3  ;;  %v385_v55 = vadd.f32 0.5, %v257_v47  ;;  %v386_v0 = vadd.f32 0.5, %v258_v39  ;;  %v259_v53 = vmul.f32 0.16666667, %v1323_v38  ;;  %v1365_v43 = vld [vmem:[#allocation2 + $0x3b8] sm:$0xff] }
  0x8b   :  { %892 = vst [vmem:[#allocation5 + $0x318] sm:$0xff] %v764_v46  ;;  %v767_v62 = vmul.f32 %v639_v49, %v1306_v4  ;;  %v640_v63 = vmin.f32 %v512_v50, 1.0  ;;  %v260_v57 = vmul.f32 0.16666667, %v1325_v42  ;;  %v261_v60 = vmul.f32 0.16666667, %v1327_v45 }
  0x8c   :  { %893 = vst [vmem:[#allocation5 + $0x320] sm:$0xff] %v765_v44  ;;  %v513_v54 = vmax.f32 %v385_v55, 0.0  ;;  %v514_v61 = vmax.f32 %v386_v0, 0.0  ;;  %v387_v59 = vadd.f32 0.5, %v259_v53  ;;  %v262_v1 = vmul.f32 0.16666667, %v134_v51 }
  0x8d   :  { %894 = vst [vmem:[#allocation5 + $0x328] sm:$0xff] %v766_v56  ;;  %v768_v2 = vmul.f32 %v640_v63, %v1309_v10  ;;  %v388_v3 = vadd.f32 0.5, %v260_v57  ;;  %v389_v8 = vadd.f32 0.5, %v261_v60  ;;  %v263_v7 = vmul.f32 0.16666667, %v1334_v52  ;;  %v1372_v0 = vld [vmem:[#allocation2 + $0x3c0] sm:$0xff] }
  0x8e   :  { %895 = vst [vmem:[#allocation5 + $0x330] sm:$0xff] %v767_v62  ;;  %v641_v4 = vmin.f32 %v513_v54, 1.0  ;;  %v642_v5 = vmin.f32 %v514_v61, 1.0  ;;  %v515_v16 = vmax.f32 %v387_v59, 0.0  ;;  %v390_v14 = vadd.f32 0.5, %v262_v1  ;;  %v146_v57 = vld [vmem:[#allocation2 + $0x3c8] sm:$0xff] }
  0x8f   :  { %896 = vst [vmem:[#allocation5 + $0x338] sm:$0xff] %v768_v2  ;;  %v516_v12 = vmax.f32 %v388_v3, 0.0  ;;  %v517_v6 = vmax.f32 %v389_v8, 0.0  ;;  %v391_v13 = vadd.f32 0.5, %v263_v7  ;;  %v264_v11 = vmul.f32 0.16666667, %v1337_v58 }
  0x90   :  { %v769_v10 = vmul.f32 %v641_v4, %v1316_v31  ;;  %v770_v17 = vmul.f32 %v642_v5, %v1318_v24  ;;  %v643_v18 = vmin.f32 %v515_v16, 1.0  ;;  %v518_v19 = vmax.f32 %v390_v14, 0.0  ;;  %v147_v8 = vld [vmem:[#allocation2 + $0x3d0] sm:$0xff]  ;;  %v148_v14 = vld [vmem:[#allocation2 + $0x3d8] sm:$0xff] }
  0x91   :  { %v644_v22 = vmin.f32 %v516_v12, 1.0  ;;  %v645_v20 = vmin.f32 %v517_v6, 1.0  ;;  %v519_v21 = vmax.f32 %v391_v13, 0.0  ;;  %v392_v32 = vadd.f32 0.5, %v264_v11  ;;  %v149_v12 = vld [vmem:[#allocation2 + $0x3e0] sm:$0xff] }
  0x92   :  { %897 = vst [vmem:[#allocation5 + $0x340] sm:$0xff] %v769_v10  ;;  %v771_v29 = vmul.f32 %v643_v18, %v1323_v38  ;;  %v646_v27 = vmin.f32 %v518_v19, 1.0  ;;  %v265_v31 = vmul.f32 0.16666667, %v1344_v15  ;;  %v266_v24 = vmul.f32 0.16666667, %v1346_v9 }
  0x93   :  { %898 = vst [vmem:[#allocation5 + $0x348] sm:$0xff] %v770_v17  ;;  %v772_v30 = vmul.f32 %v644_v22, %v1325_v42  ;;  %v773_v25 = vmul.f32 %v645_v20, %v1327_v45  ;;  %v647_v33 = vmin.f32 %v519_v21, 1.0  ;;  %v520_v34 = vmax.f32 %v392_v32, 0.0  ;;  %v150_v19 = vld [vmem:[#allocation2 + $0x3e8] sm:$0xff]  ;;  %v151_v22 = vld [vmem:[#allocation2 + $0x3f0] sm:$0xff] }
  0x94   :  { %899 = vst [vmem:[#allocation5 + $0x350] sm:$0xff] %v771_v29  ;;  %v774_v40 = vmul.f32 %v646_v27, %v134_v51  ;;  %v393_v36 = vadd.f32 0.5, %v265_v31  ;;  %v394_v48 = vadd.f32 0.5, %v266_v24  ;;  %v267_v38 = vmul.f32 0.16666667, %v1351_v23  ;;  %v152_v27 = vld [vmem:[#allocation2 + $0x3f8] sm:$0xff] }
  0x95   :  { %900 = vst [vmem:[#allocation5 + $0x358] sm:$0xff] %v772_v30  ;;  %v775_v41 = vmul.f32 %v647_v33, %v1334_v52  ;;  %v648_v47 = vmin.f32 %v520_v34, 1.0  ;;  %v268_v42 = vmul.f32 0.16666667, %v1353_v28  ;;  %v269_v45 = vmul.f32 0.16666667, %v1355_v26 }
  0x96   :  { %901 = vst [vmem:[#allocation5 + $0x360] sm:$0xff] %v773_v25  ;;  %v521_v39 = vmax.f32 %v393_v36, 0.0  ;;  %v522_v46 = vmax.f32 %v394_v48, 0.0  ;;  %v395_v44 = vadd.f32 0.5, %v267_v38  ;;  %v270_v49 = vmul.f32 0.16666667, %v142_v35 }
  0x97   :  { %902 = vst [vmem:[#allocation5 + $0x368] sm:$0xff] %v774_v40  ;;  %v776_v50 = vmul.f32 %v648_v47, %v1337_v58  ;;  %v396_v51 = vadd.f32 0.5, %v268_v42  ;;  %v397_v56 = vadd.f32 0.5, %v269_v45  ;;  %v271_v55 = vmul.f32 0.16666667, %v1362_v37 }
  0x98   :  { %903 = vst [vmem:[#allocation5 + $0x370] sm:$0xff] %v775_v41  ;;  %v649_v52 = vmin.f32 %v521_v39, 1.0  ;;  %v650_v53 = vmin.f32 %v522_v46, 1.0  ;;  %v523_v62 = vmax.f32 %v395_v44, 0.0  ;;  %v398_v63 = vadd.f32 0.5, %v270_v49 }
  0x99   :  { %904 = vst [vmem:[#allocation5 + $0x378] sm:$0xff] %v776_v50  ;;  %v524_v60 = vmax.f32 %v396_v51, 0.0  ;;  %v525_v54 = vmax.f32 %v397_v56, 0.0  ;;  %v399_v61 = vadd.f32 0.5, %v271_v55  ;;  %v272_v59 = vmul.f32 0.16666667, %v1365_v43 }
  0x9a   :  { %v777_v58 = vmul.f32 %v649_v52, %v1344_v15  ;;  %v778_v1 = vmul.f32 %v650_v53, %v1346_v9  ;;  %v651_v2 = vmin.f32 %v523_v62, 1.0  ;;  %v526_v3 = vmax.f32 %v398_v63, 0.0 }
  0x9b   :  { %v652_v7 = vmin.f32 %v524_v60, 1.0  ;;  %v653_v4 = vmin.f32 %v525_v54, 1.0  ;;  %v527_v5 = vmax.f32 %v399_v61, 0.0  ;;  %v400_v16 = vadd.f32 0.5, %v272_v59 }
  0x9c   :  { %905 = vst [vmem:[#allocation5 + $0x380] sm:$0xff] %v777_v58  ;;  %v779_v6 = vmul.f32 %v651_v2, %v1351_v23  ;;  %v654_v13 = vmin.f32 %v526_v3, 1.0  ;;  %v273_v11 = vmul.f32 0.16666667, %v1372_v0  ;;  %v274_v10 = vmul.f32 0.16666667, %v146_v57 }
  0x9d   :  { %906 = vst [vmem:[#allocation5 + $0x388] sm:$0xff] %v778_v1  ;;  %v780_v15 = vmul.f32 %v652_v7, %v1353_v28  ;;  %v781_v9 = vmul.f32 %v653_v4, %v1355_v26  ;;  %v655_v17 = vmin.f32 %v527_v5, 1.0  ;;  %v528_v18 = vmax.f32 %v400_v16, 0.0 }
  0x9e   :  { %907 = vst [vmem:[#allocation5 + $0x390] sm:$0xff] %v779_v6  ;;  %v782_v20 = vmul.f32 %v654_v13, %v142_v35  ;;  %v401_v21 = vadd.f32 0.5, %v273_v11  ;;  %v402_v32 = vadd.f32 0.5, %v274_v10  ;;  %v275_v29 = vmul.f32 0.16666667, %v147_v8 }
  0x9f   :  { %908 = vst [vmem:[#allocation5 + $0x398] sm:$0xff] %v780_v15  ;;  %v783_v23 = vmul.f32 %v655_v17, %v1362_v37  ;;  %v656_v31 = vmin.f32 %v528_v18, 1.0  ;;  %v276_v24 = vmul.f32 0.16666667, %v148_v14  ;;  %v277_v30 = vmul.f32 0.16666667, %v149_v12 }
  0xa0   :  { %909 = vst [vmem:[#allocation5 + $0x3a0] sm:$0xff] %v781_v9  ;;  %v529_v28 = vmax.f32 %v401_v21, 0.0  ;;  %v530_v25 = vmax.f32 %v402_v32, 0.0  ;;  %v403_v26 = vadd.f32 0.5, %v275_v29  ;;  %v278_v33 = vmul.f32 0.16666667, %v150_v19 }
  0xa1   :  { %910 = vst [vmem:[#allocation5 + $0x3a8] sm:$0xff] %v782_v20  ;;  %v784_v34 = vmul.f32 %v656_v31, %v1365_v43  ;;  %v404_v40 = vadd.f32 0.5, %v276_v24  ;;  %v405_v35 = vadd.f32 0.5, %v277_v30  ;;  %v279_v36 = vmul.f32 0.16666667, %v151_v22 }
  0xa2   :  { %911 = vst [vmem:[#allocation5 + $0x3b0] sm:$0xff] %v783_v23  ;;  %v657_v48 = vmin.f32 %v529_v28, 1.0  ;;  %v658_v38 = vmin.f32 %v530_v25, 1.0  ;;  %v531_v41 = vmax.f32 %v403_v26, 0.0  ;;  %v406_v47 = vadd.f32 0.5, %v278_v33 }
  0xa3   :  { %912 = vst [vmem:[#allocation5 + $0x3b8] sm:$0xff] %v784_v34  ;;  %v532_v37 = vmax.f32 %v404_v40, 0.0  ;;  %v533_v42 = vmax.f32 %v405_v35, 0.0  ;;  %v407_v45 = vadd.f32 0.5, %v279_v36  ;;  %v280_v39 = vmul.f32 0.16666667, %v152_v27 }
  0xa4   :  { %v785_v46 = vmul.f32 %v657_v48, %v1372_v0  ;;  %v786_v44 = vmul.f32 %v658_v38, %v146_v57  ;;  %v659_v49 = vmin.f32 %v531_v41, 1.0  ;;  %v534_v50 = vmax.f32 %v406_v47, 0.0 }
  0xa5   :  { %v660_v51 = vmin.f32 %v532_v37, 1.0  ;;  %v661_v43 = vmin.f32 %v533_v42, 1.0  ;;  %v535_v56 = vmax.f32 %v407_v45, 0.0  ;;  %v408_v55 = vadd.f32 0.5, %v280_v39 }
  0xa6   :  { %913 = vst [vmem:[#allocation5 + $0x3c0] sm:$0xff] %v785_v46  ;;  %v787_v52 = vmul.f32 %v659_v49, %v147_v8  ;;  %v662_v53 = vmin.f32 %v534_v50, 1.0 }
  0xa7   :  { %914 = vst [vmem:[#allocation5 + $0x3c8] sm:$0xff] %v786_v44  ;;  %v788_v62 = vmul.f32 %v660_v51, %v148_v14  ;;  %v789_v63 = vmul.f32 %v661_v43, %v149_v12  ;;  %v663_v60 = vmin.f32 %v535_v56, 1.0  ;;  %v536_v54 = vmax.f32 %v408_v55, 0.0 }
  0xa8   :  { %915 = vst [vmem:[#allocation5 + $0x3d0] sm:$0xff] %v787_v52  ;;  %v790_v61 = vmul.f32 %v662_v53, %v150_v19 }
  0xa9   :  { %916 = vst [vmem:[#allocation5 + $0x3d8] sm:$0xff] %v788_v62  ;;  %v791_v0 = vmul.f32 %v663_v60, %v151_v22  ;;  %v664_v57 = vmin.f32 %v536_v54, 1.0 }
  0xaa   :  { %917 = vst [vmem:[#allocation5 + $0x3e0] sm:$0xff] %v789_v63 }
  0xab   :  { %918 = vst [vmem:[#allocation5 + $0x3e8] sm:$0xff] %v790_v61  ;;  %v792_v59 = vmul.f32 %v664_v57, %v152_v27 }
  0xac   :  { %919 = vst [vmem:[#allocation5 + $0x3f0] sm:$0xff] %v791_v0 }
  0xad   :  { %920 = vst [vmem:[#allocation5 + $0x3f8] sm:$0xff] %v792_v59 }
  0xae   :  { %933 = dma.vmem_to_hbm [thread:$0]  %s926_s13, 16384, %s928_s16, [#allocation4], %s997_s11, %s997_s11, %s998_s12  }
  0xaf   :  { %994 = dma.done.wait [#allocation4], 16384  }
  0xb0   :  { %995 = vsyncadd [#allocation4], 4294950912 }
  0xb1   :  { %938 = vsyncpa [#allocation3], 1 }
  0xb2   :  { %939 = vsyncpa [#allocation4], 1 }

</bundles_post_ra>
